<compile_context>
chip_gen: v7x
topology: tpu7x:2x2x1
jax: 0.10.0
libtpu: 0.0.40
codegen_flags: <defaults>
</compile_context>

<pallas_src>
import jax
import jax.numpy as jnp
from jax.experimental import pallas as pl
from jax.experimental.pallas import tpu as pltpu


def _mlp_kernel(x_ref, w1_ref, b1_ref, w2_ref, b2_ref, w3_ref, b3_ref, o_ref):
    # Layer 1: (tm, 21) @ (21, 128) + (1, 128), ReLU.  Kept in f32 (tiny K).
    h1 = jnp.dot(x_ref[...], w1_ref[...], preferred_element_type=jnp.float32)
    h1 = jnp.maximum(h1 + b1_ref[...], 0.0).astype(jnp.bfloat16)
    # Layer 2: (tm, 128) @ (128, 256) + (1, 256), ReLU.  bf16 MXU, f32 acc.
    h2 = jnp.dot(h1, w2_ref[...], preferred_element_type=jnp.float32)
    h2 = jnp.maximum(h2 + b2_ref[...], 0.0).astype(jnp.bfloat16)
    # Layer 3: (tm, 256) @ (256, 500) + (1, 500).  bf16 MXU, f32 acc.
    o = jnp.dot(h2, w3_ref[...], preferred_element_type=jnp.float32)
    o_ref[...] = (o + b3_ref[...]).astype(o_ref.dtype)


def three_layer_mlp(x, w1, b1, w2, b2, w3, b3, *, tm=2048):
    """x: (N, 21) float32 with N a multiple of 79. Returns (N // 79, 79, 500).

    Weights are given as (in_features, out_features) == torch weight.T,
    biases as (1, out_features).
    """
    N, D_in = x.shape
    assert D_in == 21 and N % 79 == 0

    # Pre-cast layer-2/3 weights to bf16 once (grid-invariant); w1/biases f32.
    w2b = w2.astype(jnp.bfloat16)
    w3b = w3.astype(jnp.bfloat16)

    # Cap tm so (a) it never exceeds the (8-aligned) problem size and (b) the
    # grid has >= 2 steps so v7x megacore can split the "parallel" axis.
    half_rows = ((pl.cdiv(N, 2) + 7) // 8) * 8
    tm = max(8, min(tm, half_rows))
    assert tm % 8 == 0, "row tile tm must be a multiple of 8"
    grid = (pl.cdiv(N, tm),)

    out = pl.pallas_call(
        _mlp_kernel,
        out_shape=jax.ShapeDtypeStruct((N, 500), jnp.float32),
        grid_spec=pltpu.PrefetchScalarGridSpec(
            num_scalar_prefetch=0,
            grid=grid,
            in_specs=[
                pl.BlockSpec((tm, 21), lambda i: (i, 0)),     # x row tile (f32)
                pl.BlockSpec((21, 128), lambda i: (0, 0)),    # W1 (full, f32)
                pl.BlockSpec((1, 128), lambda i: (0, 0)),     # b1 (f32)
                pl.BlockSpec((128, 256), lambda i: (0, 0)),   # W2 (full, bf16)
                pl.BlockSpec((1, 256), lambda i: (0, 0)),     # b2 (f32)
                pl.BlockSpec((256, 500), lambda i: (0, 0)),   # W3 (full, bf16)
                pl.BlockSpec((1, 500), lambda i: (0, 0)),     # b3 (f32)
            ],
            out_specs=pl.BlockSpec((tm, 500), lambda i: (i, 0)),
        ),
        compiler_params=pltpu.CompilerParams(
            dimension_semantics=("parallel",),
            vmem_limit_bytes=48 * 1024 * 1024,
        ),
    )(x, w1, b1, w2b, b2, w3b, b3)

    # Mirror torch's x.view(-1, 79, 500) — contiguous, free view.
    return out.reshape(-1, 79, 500)


def init_params(key):
    """Deterministic init matching nn.Linear default: U(-1/sqrt(fan_in), +1/sqrt(fan_in))."""
    keys = jax.random.split(key, 6)

    def lin(kw, kb, fan_in, fan_out):
        bound = 1.0 / jnp.sqrt(float(fan_in))
        # stored as (in, out) == torch weight.T
        w = jax.random.uniform(kw, (fan_in, fan_out), jnp.float32, -bound, bound)
        b = jax.random.uniform(kb, (1, fan_out), jnp.float32, -bound, bound)
        return w, b

    w1, b1 = lin(keys[0], keys[1], 21, 128)
    w2, b2 = lin(keys[2], keys[3], 128, 256)
    w3, b3 = lin(keys[4], keys[5], 256, 500)
    return w1, b1, w2, b2, w3, b3


def reference(x, w1, b1, w2, b2, w3, b3):
    """Pure-JAX full-f32 reference mirroring the torch module's numerics."""
    hi = jax.lax.Precision.HIGHEST
    h1 = jnp.maximum(jnp.dot(x, w1, precision=hi) + b1, 0.0)
    h2 = jnp.maximum(jnp.dot(h1, w2, precision=hi) + b2, 0.0)
    o = jnp.dot(h2, w3, precision=hi) + b3
    return o.reshape(-1, 79, 500)


if __name__ == "__main__":
    key = jax.random.PRNGKey(0)
    k_x, k_p = jax.random.split(key)

    batch = 2                       # output will be (2, 79, 500)
    N = batch * 79                  # torch input is (N, 21); view(-1, 79, 500)
    x = jax.random.normal(k_x, (N, 21), jnp.float32)
    params = init_params(k_p)

    out = three_layer_mlp(x, *params)
    out = jax.block_until_ready(out)

    ref = reference(x, *params)
    assert out.shape == (batch, 79, 500), out.shape
    # Layers 2-3 run with bf16 MXU inputs (f32 accumulate); 2e-2 comfortably
    # bounds that error vs the full-f32 reference at these shapes.
    assert jnp.allclose(out, ref, atol=2e-2, rtol=2e-2), "mismatch vs f32 reference"

    print("KERNEL_OK")
</pallas_src>

<mosaic_0001>
module attributes {stable_mosaic.version = 11 : i64} {
  func.func @_mlp_kernel(%arg0: i32, %arg1: memref<80x21xf32, #tpu.memory_space<vmem>>, %arg2: memref<21x128xf32, #tpu.memory_space<vmem>>, %arg3: memref<1x128xf32, #tpu.memory_space<vmem>>, %arg4: memref<128x256xbf16, #tpu.memory_space<vmem>>, %arg5: memref<1x256xf32, #tpu.memory_space<vmem>>, %arg6: memref<256x500xbf16, #tpu.memory_space<vmem>>, %arg7: memref<1x500xf32, #tpu.memory_space<vmem>>, %arg8: memref<80x500xf32, #tpu.memory_space<vmem>>) attributes {dimension_semantics = [#tpu.dimension_semantics<parallel>], iteration_bounds = array<i64: 2>, scalar_prefetch = 0 : i64, scratch_operands = 0 : i64, tpu.core_type = #tpu.core_type<tc>, window_params = [{transform_indices = @transform_0, window_bounds = array<i64: 80, 21>}, {pipeline_mode = #tpu.pipeline_mode<synchronous>, transform_indices = @transform_1, window_bounds = array<i64: 21, 128>}, {pipeline_mode = #tpu.pipeline_mode<synchronous>, transform_indices = @transform_2, window_bounds = array<i64: 1, 128>}, {pipeline_mode = #tpu.pipeline_mode<synchronous>, transform_indices = @transform_3, window_bounds = array<i64: 128, 256>}, {pipeline_mode = #tpu.pipeline_mode<synchronous>, transform_indices = @transform_4, window_bounds = array<i64: 1, 256>}, {pipeline_mode = #tpu.pipeline_mode<synchronous>, transform_indices = @transform_5, window_bounds = array<i64: 256, 500>}, {pipeline_mode = #tpu.pipeline_mode<synchronous>, transform_indices = @transform_6, window_bounds = array<i64: 1, 500>}, {transform_indices = @transform_7, window_bounds = array<i64: 80, 500>}]} {
    %c0 = arith.constant 0 : index
    %c0_0 = arith.constant 0 : index
    %0 = vector.load %arg1[%c0, %c0_0] : memref<80x21xf32, #tpu.memory_space<vmem>>, vector<80x21xf32>
    %c0_1 = arith.constant 0 : index
    %c0_2 = arith.constant 0 : index
    %1 = vector.load %arg2[%c0_1, %c0_2] : memref<21x128xf32, #tpu.memory_space<vmem>>, vector<21x128xf32>
    %cst = arith.constant dense<0.000000e+00> : vector<80x128xf32>
    %2 = tpu.matmul %0, %1, %cst {dimension_numbers = #tpu.dot_dimension_numbers<[1], [0], [0], [1], [0, 0, 1, 1], [], []>} : vector<80x21xf32>, vector<21x128xf32>, vector<80x128xf32> -> vector<80x128xf32>
    %c0_3 = arith.constant 0 : index
    %c0_4 = arith.constant 0 : index
    %3 = vector.load %arg3[%c0_3, %c0_4] : memref<1x128xf32, #tpu.memory_space<vmem>>, vector<1x128xf32>
    %4 = vector.broadcast %3 : vector<1x128xf32> to vector<80x128xf32>
    %5 = arith.addf %2, %4 : vector<80x128xf32>
    %cst_5 = arith.constant 0.000000e+00 : f32
    %6 = vector.broadcast %cst_5 : f32 to vector<80x128xf32>
    %7 = arith.maximumf %5, %6 : vector<80x128xf32>
    %8 = arith.truncf %7 : vector<80x128xf32> to vector<80x128xbf16>
    %c0_6 = arith.constant 0 : index
    %c0_7 = arith.constant 0 : index
    %9 = vector.load %arg4[%c0_6, %c0_7] : memref<128x256xbf16, #tpu.memory_space<vmem>>, vector<128x256xbf16>
    %cst_8 = arith.constant dense<0.000000e+00> : vector<80x256xf32>
    %10 = tpu.matmul %8, %9, %cst_8 {dimension_numbers = #tpu.dot_dimension_numbers<[1], [0], [0], [1], [0, 0, 1, 1], [], []>} : vector<80x128xbf16>, vector<128x256xbf16>, vector<80x256xf32> -> vector<80x256xf32>
    %c0_9 = arith.constant 0 : index
    %c0_10 = arith.constant 0 : index
    %11 = vector.load %arg5[%c0_9, %c0_10] : memref<1x256xf32, #tpu.memory_space<vmem>>, vector<1x256xf32>
    %12 = vector.broadcast %11 : vector<1x256xf32> to vector<80x256xf32>
    %13 = arith.addf %10, %12 : vector<80x256xf32>
    %cst_11 = arith.constant 0.000000e+00 : f32
    %14 = vector.broadcast %cst_11 : f32 to vector<80x256xf32>
    %15 = arith.maximumf %13, %14 : vector<80x256xf32>
    %16 = arith.truncf %15 : vector<80x256xf32> to vector<80x256xbf16>
    %c0_12 = arith.constant 0 : index
    %c0_13 = arith.constant 0 : index
    %17 = vector.load %arg6[%c0_12, %c0_13] : memref<256x500xbf16, #tpu.memory_space<vmem>>, vector<256x500xbf16>
    %cst_14 = arith.constant dense<0.000000e+00> : vector<80x500xf32>
    %18 = tpu.matmul %16, %17, %cst_14 {dimension_numbers = #tpu.dot_dimension_numbers<[1], [0], [0], [1], [0, 0, 1, 1], [], []>} : vector<80x256xbf16>, vector<256x500xbf16>, vector<80x500xf32> -> vector<80x500xf32>
    %c0_15 = arith.constant 0 : index
    %c0_16 = arith.constant 0 : index
    %19 = vector.load %arg7[%c0_15, %c0_16] : memref<1x500xf32, #tpu.memory_space<vmem>>, vector<1x500xf32>
    %20 = vector.broadcast %19 : vector<1x500xf32> to vector<80x500xf32>
    %21 = arith.addf %18, %20 : vector<80x500xf32>
    %c0_17 = arith.constant 0 : index
    %c0_18 = arith.constant 0 : index
    %22 = vector.load %arg8[%c0_17, %c0_18] : memref<80x500xf32, #tpu.memory_space<vmem>>, vector<80x500xf32>
    tpu.vector_store %arg8[%c0_17, %c0_18], %21 {strides = array<i32>} : memref<80x500xf32, #tpu.memory_space<vmem>>, vector<80x500xf32>,
    return
  }
  func.func @transform_0(%arg0: i32) -> (i32, i32) {
    %c0_i32 = arith.constant 0 : i32
    %c0_i32_0 = arith.constant 0 : i32
    return %arg0, %c0_i32 : i32, i32
  }
  func.func @transform_1(%arg0: i32) -> (i32, i32) {
    %c0_i32 = arith.constant 0 : i32
    %c0_i32_0 = arith.constant 0 : i32
    %c0_i32_1 = arith.constant 0 : i32
    return %c0_i32, %c0_i32_0 : i32, i32
  }
  func.func @transform_2(%arg0: i32) -> (i32, i32) {
    %c0_i32 = arith.constant 0 : i32
    %c0_i32_0 = arith.constant 0 : i32
    %c0_i32_1 = arith.constant 0 : i32
    return %c0_i32, %c0_i32_0 : i32, i32
  }
  func.func @transform_3(%arg0: i32) -> (i32, i32) {
    %c0_i32 = arith.constant 0 : i32
    %c0_i32_0 = arith.constant 0 : i32
    %c0_i32_1 = arith.constant 0 : i32
    return %c0_i32, %c0_i32_0 : i32, i32
  }
  func.func @transform_4(%arg0: i32) -> (i32, i32) {
    %c0_i32 = arith.constant 0 : i32
    %c0_i32_0 = arith.constant 0 : i32
    %c0_i32_1 = arith.constant 0 : i32
    return %c0_i32, %c0_i32_0 : i32, i32
  }
  func.func @transform_5(%arg0: i32) -> (i32, i32) {
    %c0_i32 = arith.constant 0 : i32
    %c0_i32_0 = arith.constant 0 : i32
    %c0_i32_1 = arith.constant 0 : i32
    return %c0_i32, %c0_i32_0 : i32, i32
  }
  func.func @transform_6(%arg0: i32) -> (i32, i32) {
    %c0_i32 = arith.constant 0 : i32
    %c0_i32_0 = arith.constant 0 : i32
    %c0_i32_1 = arith.constant 0 : i32
    return %c0_i32, %c0_i32_0 : i32, i32
  }
  func.func @transform_7(%arg0: i32) -> (i32, i32) {
    %c0_i32 = arith.constant 0 : i32
    %c0_i32_0 = arith.constant 0 : i32
    return %arg0, %c0_i32 : i32, i32
  }
}

</mosaic_0001>

<bundles_post_ra>
// kernel: tpu_custom_call.1
= control target key start
LH: loop header
LB: loop body
LE: loop exit
PB: predicated region body
PF: predicated region fallthrough
CT: control target
= control target key end

     0   :  { %12 = vsyncpa [#allocation3], 0  ;;  %s2322_s0 = inlined_call_operand.vmem [shape: f32[158,21], index: 0, kind: input, shape index: {}]   ;;  %s2323_s1 = inlined_call_operand.vmem [shape: f32[21,128], index: 1, kind: input, shape index: {}]   ;;  %s2324_s2 = inlined_call_operand.vmem [shape: f32[1,128], index: 2, kind: input, shape index: {}]   ;;  %s2325_s3 = inlined_call_operand.vmem [shape: bf16[128,256], index: 3, kind: input, shape index: {}]   ;;  %s2326_s4 = inlined_call_operand.vmem [shape: f32[1,256], index: 4, kind: input, shape index: {}]   ;;  %s2327_s5 = inlined_call_operand.vmem [shape: bf16[256,500], index: 5, kind: input, shape index: {}]   ;;  %s2328_s6 = inlined_call_operand.vmem [shape: f32[1,500], index: 6, kind: input, shape index: {}]   ;;  %s2329_s7 = inlined_call_operand.hbm [shape: f32[158,500], index: 7, kind: output, shape index: {}]  }
   0x1   :  { %14 = vsyncpa [#allocation3 + $0x1], 0  ;;  %s1790_s24 = smov 0   ;;  %s1792_s25 = smov 0  }
   0x2   :  { %s1794_s26 = smov 0   ;;  %s1796_s27 = smov 0  }
   0x3 LB: > { %s1811_s28 = sadd.s32 4294967295, %s1744_s27   ;;  %s1377_s29 = sadd.s32 4294967294, %s1744_s27   ;;  %s1744_s27 = sphi %s1796_s27, %s2335_s27   ;;  %s1740_s26 = sphi %s1794_s26, %s2334_s26   ;;  %s1736_s25 = sphi %s1792_s25, %s2333_s25   ;;  %s1732_s24 = sphi %s1790_s24, %s2332_s24  }
   0x4   : > { %s1815_s30 = sadd.s32 1, %s1744_s27   ;;  %s179_s8 = sadd.s32 1, %s1740_s26 }
   0x5   : > { %s176_s9 = ssub.s32 %s1744_s27, %s1815_s30  ;;  %p189_p0 = scmp.ne.s32.totalorder %s1740_s26, %s1736_s25 }
   0x6   : > { %p177_p1 = scmp.eq.s32.totalorder %s176_s9, 0  ;;  %p190_p2 = scmp.eq.s32.totalorder %s1811_s28, 1 }
   0x7   : > { %p195_p3 = scmp.ne.s32.totalorder %s1736_s25, %s1732_s24  ;;  %p196_p4 = scmp.eq.s32.totalorder %s1377_s29, 1 }
   0x8   : > { %s1826_s10 = scalar_select %p177_p1, %s1740_s26, %s179_s8  }
   0x9   : > { %p1828_p5 = por %p190_p2, %p189_p0  ;;  %p1832_p6 = por %p196_p4, %p195_p3 }
   0xa   : > { %p1380_p7 = scmp.ge.s32.totalorder %s1744_s27, 1  ;;  %p241_p8 = scmp.lt.s32.totalorder %s1744_s27, 3 }
   0xc   : > { %p242_p9 = pnand %p1380_p7, %p241_p8 }
   0xd   : > { %v291_v0 = vld [vmem:[%s2323_s1] sm:$0xff] (!%p242_p9)  ;;  %v292_v1 = vld [vmem:[%s2323_s1 + $0x8] sm:$0xff] (!%p242_p9)  ;;  %v293_v2 = vld [vmem:[%s2323_s1 + $0x10] sm:$0x1f] (!%p242_p9)  ;;  %s273_s19 = smul.u32 (!%p242_p9), 10, %s1811_s28  ;;  %vm332_vm0 = vcmask (!%p242_p9), 1044480  }
   0xe   : > { %245 = sbr.rel (%p242_p9) target bundleno = 731 (0x2db), region = 48  ;;  %v1515_v3 = vpack.c.bf16 (!%p242_p9), %v292_v1, %v291_v0  ;;  %v1562_v4 = vld [vmem:[%s2325_s3 + $0x4] ss:$8 sps:$4 sm:$0xff] (!%p242_p9)   ;;  %v1564_v5 = vld [vmem:[%s2325_s3] ss:$8 sps:$4 sm:$0xff] (!%p242_p9)   ;;  %vm301_vm1 = vcmask (!%p242_p9), 171008  }
   0xf   : > { %p274_p10 = scmp.lt.s32.totalorder (!%p242_p9), %s273_s19, 19  ;;  %574 = vmatprep.subr.bf16.mxu1 (!%p242_p9), %v1562_v4  ;;  %v1565_v6 = vld [vmem:[%s2325_s3 + $0x14] ss:$8 sps:$4 sm:$0xff] (!%p242_p9)   ;;  %v1567_v7 = vld [vmem:[%s2325_s3 + $0x10] ss:$8 sps:$4 sm:$0xff] (!%p242_p9)   ;;  %v1746_v30 = vmov (!%p242_p9), 0  }
  0x10   : > { %1516 = vmatprep.subr.bf16.mxu0 (!%p242_p9), %v1515_v3  ;;  %575 = vmatpush1.bf16.msra.mxu1 (!%p242_p9), %v1564_v5  ;;  %v1568_v8 = vld [vmem:[%s2325_s3 + $0x24] ss:$8 sps:$4 sm:$0xff] (!%p242_p9)   ;;  %v1570_v9 = vld [vmem:[%s2325_s3 + $0x20] ss:$8 sps:$4 sm:$0xff] (!%p242_p9)   ;;  %v1571_v13 = vld [vmem:[%s2325_s3 + $0x34] ss:$8 sps:$4 sm:$0xff] (!%p242_p9)  }
  0x11   : > { %1518 = vmatpush3.bf16.msra.mxu0 (!%p242_p9), %v1515_v3  ;;  %576 = vmatprep.subr.bf16.mxu1 (!%p242_p9), %v1565_v6  ;;  %v1573_v14 = vld [vmem:[%s2325_s3 + $0x30] ss:$8 sps:$4 sm:$0xff] (!%p242_p9)   ;;  %v1574_v16 = vld [vmem:[%s2325_s3 + $0x44] ss:$8 sps:$4 sm:$0xff] (!%p242_p9)   ;;  %v1576_v20 = vld [vmem:[%s2325_s3 + $0x40] ss:$8 sps:$4 sm:$0xff] (!%p242_p9)  }
  0x12   : > { %1498 = vmatprep.subr.msk.mxu0 (!%p242_p9), %vm332_vm0, %v293_v2  ;;  %v1577_v21 = vld [vmem:[%s2325_s3 + $0x54] ss:$8 sps:$4 sm:$0xff] (!%p242_p9)   ;;  %v1579_v24 = vld [vmem:[%s2325_s3 + $0x50] ss:$8 sps:$4 sm:$0xff] (!%p242_p9)   ;;  %v1580_v26 = vld [vmem:[%s2325_s3 + $0x64] ss:$8 sps:$4 sm:$0xff] (!%p242_p9)   ;;  %606 = vmatprep.mubr.bf16.mxu1 (!%p242_p9), %v1746_v30 }
  0x13   : > { %v1582_v27 = vld [vmem:[%s2325_s3 + $0x60] ss:$8 sps:$4 sm:$0xff] (!%p242_p9)   ;;  %v1583_v28 = vld [vmem:[%s2325_s3 + $0x74] ss:$8 sps:$4 sm:$0xff] (!%p242_p9)   ;;  %v1585_v29 = vld [vmem:[%s2325_s3 + $0x70] ss:$8 sps:$4 sm:$0xff] (!%p242_p9)  }
  0x14   : > { %577 = vmatpush1.bf16.msra.mxu1 (!%p242_p9), %v1567_v7  ;;  %v1586_v31 = vld [vmem:[%s2327_s5] ss:$16 sps:$4 sm:$0xff] (!%p242_p9)   ;;  %v1588_v32 = vld [vmem:[%s2327_s5 + $0x4] ss:$16 sps:$4 sm:$0xff] (!%p242_p9)   ;;  %v1591_v33 = vld [vmem:[%s2327_s5 + $0xc] ss:$16 sps:$4 sm:$0xff] (!%p242_p9)  }
  0x15   : > { %s2337_s19 = smov (!%p274_p10, %s273_s19), 19  ;;  %1499 = vmatpush3.msk.msra.mxu0 %vm332_vm0, %v293_v2  ;;  %578 = vmatprep.subr.bf16.mxu1 %v1568_v8  ;;  %v1594_v34 = vld [vmem:[%s2327_s5 + $0x24] ss:$16 sps:$4 sm:$0xff]   ;;  %v1592_v35 = vld [vmem:[%s2327_s5 + $0x20] ss:$16 sps:$4 sm:$0xff]   ;;  %s270_s22 = sand.u32 1, %s1736_s25  }
  0x16   : > { %s1381_s16 = sshll.u32 %s2337_s19, 3  ;;  %1093 = vmatprep.subr.bf16.mxu0 %v1588_v32  ;;  %v1600_v36 = vld [vmem:[%s2327_s5 + $0x44] ss:$16 sps:$4 sm:$0xff]   ;;  %v1598_v37 = vld [vmem:[%s2327_s5 + $0x40] ss:$16 sps:$4 sm:$0xff]   ;;  %s1519_s29 = smul.u32 320, %s270_s22 }
  0x17   : > { %s1867_s20 = scalar_lea.vmem %s2322_s0, %s1381_s16  ;;  %v1606_v38 = vld [vmem:[%s2327_s5 + $0x64] ss:$16 sps:$4 sm:$0xff]   ;;  %v1604_v39 = vld [vmem:[%s2327_s5 + $0x60] ss:$16 sps:$4 sm:$0xff]   ;;  %v1589_v6 = vld [vmem:[%s2327_s5 + $0x8] ss:$16 sps:$4 sm:$0xff]  }
  0x18   : > { %v281_v10 = vld [vmem:[%s1867_s20] sm:$0xff]  ;;  %v282_v11 = vld [vmem:[%s1867_s20 + $0x8] sm:$0xff]  ;;  %v283_v12 = vld [vmem:[%s1867_s20 + $0x10] sm:$0xff]  ;;  %579 = vmatpush1.bf16.msra.mxu1 %v1570_v9  ;;  %vm1262_vm2 = vcmask 949248   ;;  %s2182_s8 = scalar_lea.vmem [#allocation2], %s1519_s29  ;;  %s2281_s15 = scalar_lea.sflag [#allocation3], %s270_s22 }
  0x19   : > { %1500 = vmatprep.mubr.msk.f32.mxu0 %vm301_vm1, %v281_v10  ;;  %v284_v15 = vld [vmem:[%s1867_s20 + $0x18] sm:$0xff]  ;;  %v285_v17 = vld [vmem:[%s1867_s20 + $0x20] sm:$0xff]  ;;  %v286_v18 = vld [vmem:[%s1867_s20 + $0x28] sm:$0xff]  ;;  %580 = vmatprep.subr.bf16.mxu1 %v1571_v13  ;;  %s1315_s9 = sshll.u32 %s2182_s8, 4  ;;  %s1747_s17 = smov [#allocation2]   ;;  %s2267_s9 = int_to_ptr.vmem [resolvable:$true] %s1315_s9 }
  0x1a   : > { %1501 = vmatmul.mubr.msk.f32.vlgmr.msra.gmra.mrb[0].mxu0 %vm301_vm1, %v282_v11  ;;  %v287_v19 = vld [vmem:[%s1867_s20 + $0x30] sm:$0xff]  ;;  %v288_v22 = vld [vmem:[%s1867_s20 + $0x38] sm:$0xff]  ;;  %v289_v23 = vld [vmem:[%s1867_s20 + $0x40] sm:$0xff]  ;;  %s1682_s16 = scalar_lea.vmem %s2267_s9, 5120  ;;  %s1686_s18 = sshll.u32 %s1747_s17, 4  ;;  %s1687_s18 = int_to_ptr.vmem [resolvable:$false] %s1686_s18 }
  0x1b   : > { %1503 = vmatprep.mubr.msk.f32.mxu0 %vm301_vm1, %v283_v12  ;;  %v290_v25 = vld [vmem:[%s1867_s20 + $0x48] sm:$0xff]  ;;  %1094 = vmatpush1.bf16.msra.mxu0 %v1586_v31  ;;  %v1612_v40 = vld [vmem:[%s2327_s5 + $0x84] ss:$16 sps:$4 sm:$0xff]   ;;  %v1610_v41 = vld [vmem:[%s2327_s5 + $0x80] ss:$16 sps:$4 sm:$0xff]   ;;  %s1480_s20 = smul.u32 5120, %s1811_s28  ;;  %p1683_p11 = scmp.ne.s32.totalorder %s2267_s9, %s1682_s16 }
  0x1c   : > { %581 = vmatpush1.bf16.msra.mxu1 %v1573_v14  ;;  %1095 = vmatprep.subr.bf16.mxu0 %v1594_v34  ;;  %v1618_v42 = vld [vmem:[%s2327_s5 + $0xa4] ss:$16 sps:$4 sm:$0xff]   ;;  %v1616_v43 = vld [vmem:[%s2327_s5 + $0xa0] ss:$16 sps:$4 sm:$0xff]   ;;  %v1597_v9 = vld [vmem:[%s2327_s5 + $0x2c] ss:$16 sps:$4 sm:$0xff]   ;;  %p1689_p0 = scmp.lt.s32.totalorder %s2267_s9, %s1687_s18 }
  0x1d   : > { %582 = vmatprep.subr.bf16.mxu1 %v1574_v16  ;;  %v1624_v44 = vld [vmem:[%s2327_s5 + $0xc4] ss:$16 sps:$4 sm:$0xff]   ;;  %v1622_v45 = vld [vmem:[%s2327_s5 + $0xc0] ss:$16 sps:$4 sm:$0xff]   ;;  %v1607_v34 = vld [vmem:[%s2327_s5 + $0x68] ss:$16 sps:$4 sm:$0xff]   ;;  %s2265_s14 = scalar_lea.hbm %s2329_s7, %s1480_s20  ;;  %p1684_p12 = pnand %p1683_p11, %p1828_p5 }
  0x1e   : > { %1504 = vmatmul.mubr.msk.f32.gmra.mrb[2].mxu0 %vm301_vm1, %v284_v15  ;;  %v1630_v46 = vld [vmem:[%s2327_s5 + $0xe4] ss:$16 sps:$4 sm:$0xff]   ;;  %v1628_v47 = vld [vmem:[%s2327_s5 + $0xe0] ss:$16 sps:$4 sm:$0xff]   ;;  %v1595_v15 = vld [vmem:[%s2327_s5 + $0x28] ss:$16 sps:$4 sm:$0xff]  }
  0x1f   : > { %1506 = vmatprep.mubr.msk.f32.mxu0 %vm301_vm1, %v285_v17  ;;  %1096 = vmatpush1.bf16.msra.mxu0 %v1592_v35  ;;  %v1636_v48 = vld [vmem:[%s2327_s5 + $0x104] ss:$16 sps:$4 sm:$0xff]   ;;  %v1634_v49 = vld [vmem:[%s2327_s5 + $0x100] ss:$16 sps:$4 sm:$0xff]   ;;  %p1685_p13 = pneg %p1684_p12  ;;  %s1688_s21 = scalar_lea.vmem %s1687_s18, 10240 }
  0x20   : > { %583 = vmatpush1.bf16.msra.mxu1 %v1576_v20  ;;  %1097 = vmatprep.subr.bf16.mxu0 %v1600_v36  ;;  %v1642_v50 = vld [vmem:[%s2327_s5 + $0x124] ss:$16 sps:$4 sm:$0xff]   ;;  %v1640_v51 = vld [vmem:[%s2327_s5 + $0x120] ss:$16 sps:$4 sm:$0xff]   ;;  %p1690_p1 = scmp.lt.s32.totalorder %s1688_s21, %s1682_s16 }
  0x21   : > { %584 = vmatprep.subr.bf16.mxu1 %v1577_v21  ;;  %v1648_v52 = vld [vmem:[%s2327_s5 + $0x144] ss:$16 sps:$4 sm:$0xff]   ;;  %v1646_v53 = vld [vmem:[%s2327_s5 + $0x140] ss:$16 sps:$4 sm:$0xff]  }
  0x22   : > { %1507 = vmatmul.mubr.msk.f32.gmra.mrb[4].mxu0 %vm301_vm1, %v286_v18  ;;  %v1654_v54 = vld [vmem:[%s2327_s5 + $0x164] ss:$16 sps:$4 sm:$0xff]   ;;  %v1652_v55 = vld [vmem:[%s2327_s5 + $0x160] ss:$16 sps:$4 sm:$0xff]   ;;  %v1603_v18 = vld [vmem:[%s2327_s5 + $0x4c] ss:$16 sps:$4 sm:$0xff]   ;;  %p1691_p2 = por %p1690_p1, %p1689_p0 }
  0x23   : > { %1509 = vmatprep.mubr.msk.f32.mxu0 %vm301_vm1, %v287_v19  ;;  %1098 = vmatpush1.bf16.msra.mxu0 %v1598_v37  ;;  %v1660_v56 = vld [vmem:[%s2327_s5 + $0x184] ss:$16 sps:$4 sm:$0xff]   ;;  %v1658_v57 = vld [vmem:[%s2327_s5 + $0x180] ss:$16 sps:$4 sm:$0xff]   ;;  %v1615_v37 = vld [vmem:[%s2327_s5 + $0x8c] ss:$16 sps:$4 sm:$0xff]  }
  0x24   : > { %585 = vmatpush1.bf16.msra.mxu1 %v1579_v24  ;;  %1099 = vmatprep.subr.bf16.mxu0 %v1606_v38  ;;  %v1666_v58 = vld [vmem:[%s2327_s5 + $0x1a4] ss:$16 sps:$4 sm:$0xff]   ;;  %v1664_v59 = vld [vmem:[%s2327_s5 + $0x1a0] ss:$16 sps:$4 sm:$0xff]   ;;  %v1601_v24 = vld [vmem:[%s2327_s5 + $0x48] ss:$16 sps:$4 sm:$0xff]   ;;  %p1692_p3 = pnand %p1691_p2, %p1685_p13 }
  0x25   : > { %586 = vmatprep.subr.bf16.mxu1 %v1580_v26  ;;  %v1382_v60 = vld [vmem:[%s2324_s2] ss:$0 sm:$0xff] }
  0x26   : > { %1510 = vmatmul.mubr.msk.f32.gmra.mrb[6].mxu0 %vm301_vm1, %v288_v22 }
  0x27   : > { %1512 = vmatprep.mubr.msk.f32.mxu0 %vm301_vm1, %v289_v23  ;;  %1100 = vmatpush1.bf16.msra.mxu0 %v1604_v39 }
  0x28   : > { %587 = vmatpush1.bf16.msra.mxu1 %v1582_v27  ;;  %1101 = vmatprep.subr.bf16.mxu0 %v1612_v40  ;;  %v1609_v27 = vld [vmem:[%s2327_s5 + $0x6c] ss:$16 sps:$4 sm:$0xff]   ;;  %v1613_v40 = vld [vmem:[%s2327_s5 + $0x88] ss:$16 sps:$4 sm:$0xff]  }
  0x29   : > { %588 = vmatprep.subr.bf16.mxu1 %v1583_v28 }
  0x2a   : > { %1513 = vmatmul.mubr.msk.f32.gmra.mrb[8].mxu0 %vm301_vm1, %v290_v25 }
  0x2b   : > { %1102 = vmatpush1.bf16.msra.mxu0 %v1610_v41 }
  0x2c   : > { %589 = vmatpush1.bf16.msra.mxu1 %v1585_v29  ;;  %1103 = vmatprep.subr.bf16.mxu0 %v1618_v42  ;;  %v1621_v42 = vld [vmem:[%s2327_s5 + $0xac] ss:$16 sps:$4 sm:$0xff]  }
  0x2d   : > { %1176 = vmatprep.subr.bf16.mxu1 %v1591_v33 }
  0x2f   : > { %1104 = vmatpush1.bf16.msra.mxu0 %v1616_v43  ;;  %v1619_v43 = vld [vmem:[%s2327_s5 + $0xa8] ss:$16 sps:$4 sm:$0xff]  }
  0x30   : > { %1105 = vmatprep.subr.bf16.mxu0 %v1624_v44  ;;  %v1627_v44 = vld [vmem:[%s2327_s5 + $0xcc] ss:$16 sps:$4 sm:$0xff]  }
  0x33   : > { %1106 = vmatpush1.bf16.msra.mxu0 %v1622_v45  ;;  %v1625_v45 = vld [vmem:[%s2327_s5 + $0xc8] ss:$16 sps:$4 sm:$0xff]  }
  0x34   : > { %1107 = vmatprep.subr.bf16.mxu0 %v1630_v46  ;;  %v1633_v46 = vld [vmem:[%s2327_s5 + $0xec] ss:$16 sps:$4 sm:$0xff]  }
  0x37   : > { %1108 = vmatpush1.bf16.msra.mxu0 %v1628_v47  ;;  %v1631_v47 = vld [vmem:[%s2327_s5 + $0xe8] ss:$16 sps:$4 sm:$0xff]  }
  0x38   : > { %1109 = vmatprep.subr.bf16.mxu0 %v1636_v48  ;;  %v1639_v48 = vld [vmem:[%s2327_s5 + $0x10c] ss:$16 sps:$4 sm:$0xff]  }
  0x3b   : > { %1110 = vmatpush1.bf16.msra.mxu0 %v1634_v49  ;;  %v1637_v49 = vld [vmem:[%s2327_s5 + $0x108] ss:$16 sps:$4 sm:$0xff]  }
  0x3c   : > { %1111 = vmatprep.subr.bf16.mxu0 %v1642_v50  ;;  %v1643_v50 = vld [vmem:[%s2327_s5 + $0x128] ss:$16 sps:$4 sm:$0xff]  }
  0x3f   : > { %1112 = vmatpush1.bf16.msra.mxu0 %v1640_v51  ;;  %v1651_v51 = vld [vmem:[%s2327_s5 + $0x14c] ss:$16 sps:$4 sm:$0xff]  }
  0x40   : > { %1113 = vmatprep.subr.bf16.mxu0 %v1648_v52  ;;  %v1649_v52 = vld [vmem:[%s2327_s5 + $0x148] ss:$16 sps:$4 sm:$0xff]  }
  0x43   : > { %1114 = vmatpush1.bf16.msra.mxu0 %v1646_v53  ;;  %v1657_v53 = vld [vmem:[%s2327_s5 + $0x16c] ss:$16 sps:$4 sm:$0xff]  }
  0x44   : > { %1115 = vmatprep.subr.bf16.mxu0 %v1654_v54  ;;  %v1655_v54 = vld [vmem:[%s2327_s5 + $0x168] ss:$16 sps:$4 sm:$0xff]  }
  0x47   : > { %1116 = vmatpush1.bf16.msra.mxu0 %v1652_v55  ;;  %v1663_v55 = vld [vmem:[%s2327_s5 + $0x18c] ss:$16 sps:$4 sm:$0xff]  }
  0x48   : > { %1117 = vmatprep.subr.bf16.mxu0 %v1660_v56  ;;  %v1661_v56 = vld [vmem:[%s2327_s5 + $0x188] ss:$16 sps:$4 sm:$0xff]  }
  0x4b   : > { %1118 = vmatpush1.bf16.msra.mxu0 %v1658_v57  ;;  %v1669_v57 = vld [vmem:[%s2327_s5 + $0x1ac] ss:$16 sps:$4 sm:$0xff]  }
  0x4c   : > { %1119 = vmatprep.subr.bf16.mxu0 %v1666_v58  ;;  %v1667_v58 = vld [vmem:[%s2327_s5 + $0x1a8] ss:$16 sps:$4 sm:$0xff]  }
  0x4f   : > { %1120 = vmatpush1.bf16.msra.mxu0 %v1664_v59  ;;  %v1672_v59 = vld [vmem:[%s2327_s5 + $0x1c4] ss:$16 sps:$4 sm:$0xff]  }
  0x50   : > { %1121 = vmatprep.subr.bf16.mxu0 %v1672_v59 }
  0xed   : > { %v1502_v61 = vpop.f32.mrb[0].mxu0 }
  0xee   : > { %v408_v62 = vadd.f32 %v1502_v61, %v1382_v60  ;;  %v402_v63 = vpop.f32.mrb[1].mxu0  ;;  %v1670_v61 = vld [vmem:[%s2327_s5 + $0x1c0] ss:$16 sps:$4 sm:$0xff]  }
  0xef   : > { %v403_v0 = vadd.f32 %v1382_v60, %v402_v63  ;;  %1122 = vmatpush1.bf16.msra.mxu0 %v1670_v61  ;;  %v1678_v63 = vld [vmem:[%s2327_s5 + $0x1e4] ss:$16 sps:$4 sm:$0xff]  }
  0xf0   : > { %v452_v1 = vmax.f32 %v408_v62, 0.0  ;;  %v1673_v62 = vld [vmem:[%s2327_s5 + $0x1c8] ss:$16 sps:$4 sm:$0xff]   ;;  %1123 = vmatprep.subr.bf16.mxu0 %v1678_v63 }
  0xf1   : > { %v451_v2 = vmax.f32 %v403_v0, 0.0  ;;  %v1505_v3 = vpop.f32.mrb[2].mxu0  ;;  %v1681_v0 = vld [vmem:[%s2327_s5 + $0x1ec] ss:$16 sps:$4 sm:$0xff]  }
  0xf2   : > { %v418_v4 = vadd.f32 %v1505_v3, %v1382_v60  ;;  %v412_v5 = vpop.f32.mrb[3].mxu0  ;;  %v484_v3 = vlaneseq }
  0xf3   : > { %v461_v7 = vpack.c.bf16 %v452_v1, %v451_v2  ;;  %v413_v8 = vadd.f32 %v1382_v60, %v412_v5  ;;  %v1676_v1 = vld [vmem:[%s2327_s5 + $0x1e0] ss:$16 sps:$4 sm:$0xff]   ;;  %v1679_v2 = vld [vmem:[%s2327_s5 + $0x1e8] ss:$16 sps:$4 sm:$0xff]  }
  0xf4   : > { %v454_v10 = vmax.f32 %v418_v4, 0.0  ;;  %1124 = vmatpush1.bf16.msra.mxu0 %v1676_v1  ;;  %v2123_v4 = vshrl.u32 %v484_v3, 7 }
  0xf5   : > { %v453_v11 = vmax.f32 %v413_v8, 0.0  ;;  %607 = vmatmul.mubr.bf16.vlgmr.msra.gmra.mrb[0].mxu1 %v461_v7  ;;  %v1508_v12 = vpop.f32.mrb[4].mxu0 }
  0xf6   : > { %v428_v13 = vadd.f32 %v1508_v12, %v1382_v60  ;;  %616 = vmatprep.mubr.bf16.mxu1 %v1746_v30  ;;  %v422_v14 = vpop.f32.mrb[5].mxu0  ;;  %1177 = vmatpush1.bf16.msra.mxu1 %v1589_v6  ;;  %v486_v5 = vsub.s32 0, %v2123_v4  ;;  %v482_v6 = vld [vmem:[%s2326_s4] sm:$0x3]  ;;  %v490_v7 = vsub.s32 1, %v2123_v4 }
  0xf7   : > { %v462_v16 = vpack.c.bf16 %v454_v10, %v453_v11  ;;  %v423_v17 = vadd.f32 %v1382_v60, %v422_v14  ;;  %1178 = vmatprep.subr.bf16.mxu1 %v1597_v9 }
  0xf8   : > { %v456_v19 = vmax.f32 %v428_v13, 0.0  ;;  %v2132_v8 = vrot.slane %v482_v6, %v486_v5  ;;  %v2136_v9 = vrot.slane %v482_v6, %v490_v7 }
  0xf9   : > { %v455_v20 = vmax.f32 %v423_v17, 0.0  ;;  %v1511_v21 = vpop.f32.mrb[6].mxu0 }
  0xfa   : > { %v438_v22 = vadd.f32 %v1511_v21, %v1382_v60  ;;  %v432_v23 = vpop.f32.mrb[7].mxu0  ;;  %1179 = vmatpush1.bf16.msra.mxu1 %v1595_v15 }
  0xfb   : > { %v463_v25 = vpack.c.bf16 %v456_v19, %v455_v20  ;;  %v433_v26 = vadd.f32 %v1382_v60, %v432_v23  ;;  %1180 = vmatprep.subr.bf16.mxu1 %v1603_v18 }
  0xfc   : > { %v458_v28 = vmax.f32 %v438_v22, 0.0 }
  0xfd   : > { %617 = vmatmul.mubr.bf16.gmra.mrb[4].mxu1 %v462_v16  ;;  %v457_v29 = vmax.f32 %v433_v26, 0.0  ;;  %v1514_v31 = vpop.f32.mrb[8].mxu0 }
  0xfe   : > { %626 = vmatprep.mubr.bf16.mxu1 %v1746_v30  ;;  %v448_v32 = vadd.f32 %v1514_v31, %v1382_v60  ;;  %v442_v33 = vpop.f32.mrb[9].mxu0  ;;  %1181 = vmatpush1.bf16.msra.mxu1 %v1601_v24 }
  0xff   : > { %v464_v35 = vpack.c.bf16 %v458_v28, %v457_v29  ;;  %v443_v36 = vadd.f32 %v1382_v60, %v442_v33  ;;  %1182 = vmatprep.subr.bf16.mxu1 %v1609_v27  ;;  %v1675_v60 = vld [vmem:[%s2327_s5 + $0x1cc] ss:$16 sps:$4 sm:$0xff]  }
 0x100   : > { %v460_v38 = vmax.f32 %v448_v32, 0.0 }
 0x101   : > { %v459_v39 = vmax.f32 %v443_v36, 0.0 }
 0x102   : > { %1183 = vmatpush1.bf16.msra.mxu1 %v1607_v34 }
 0x103   : > { %v465_v41 = vpack.c.bf16 %v460_v38, %v459_v39  ;;  %1184 = vmatprep.subr.bf16.mxu1 %v1615_v37 }
 0x105   : > { %627 = vmatmul.mubr.bf16.gmra.mrb[8].mxu1 %v463_v25 }
 0x106   : > { %636 = vmatprep.mubr.bf16.mxu1 %v1746_v30  ;;  %1185 = vmatpush1.bf16.msra.mxu1 %v1613_v40 }
 0x107   : > { %1186 = vmatprep.subr.bf16.mxu1 %v1621_v42 }
 0x10a   : > { %1187 = vmatpush1.bf16.msra.mxu1 %v1619_v43 }
 0x10b   : > { %1188 = vmatprep.subr.bf16.mxu1 %v1627_v44 }
 0x10d   : > { %637 = vmatmul.mubr.bf16.gmra.mrb[12].mxu1 %v464_v35 }
 0x10e   : > { %646 = vmatprep.mubr.bf16.mxu1 %v1746_v30  ;;  %1189 = vmatpush1.bf16.msra.mxu1 %v1625_v45  ;;  %v1645_v30 = vld [vmem:[%s2327_s5 + $0x12c] ss:$16 sps:$4 sm:$0xff]  }
 0x10f   : > { %1190 = vmatprep.subr.bf16.mxu1 %v1633_v46 }
 0x112   : > { %1191 = vmatpush1.bf16.msra.mxu1 %v1631_v47 }
 0x113   : > { %1192 = vmatprep.subr.bf16.mxu1 %v1639_v48 }
 0x115   : > { %647 = vmatmul.mubr.bf16.gmra.mrb[16].mxu1 %v465_v41 }
 0x116   : > { %1193 = vmatpush1.bf16.msra.mxu1 %v1637_v49 }
 0x117   : > { %1194 = vmatprep.subr.bf16.mxu1 %v1645_v30 }
 0x11a   : > { %1195 = vmatpush1.bf16.msra.mxu1 %v1643_v50 }
 0x11b   : > { %1196 = vmatprep.subr.bf16.mxu1 %v1651_v51 }
 0x11e   : > { %1197 = vmatpush1.bf16.msra.mxu1 %v1649_v52 }
 0x11f   : > { %1198 = vmatprep.subr.bf16.mxu1 %v1657_v53 }
 0x122   : > { %1199 = vmatpush1.bf16.msra.mxu1 %v1655_v54 }
 0x123   : > { %1200 = vmatprep.subr.bf16.mxu1 %v1663_v55 }
 0x126   : > { %1201 = vmatpush1.bf16.msra.mxu1 %v1661_v56 }
 0x127   : > { %1202 = vmatprep.subr.bf16.mxu1 %v1669_v57 }
 0x12a   : > { %1203 = vmatpush1.bf16.msra.mxu1 %v1667_v58 }
 0x12b   : > { %1204 = vmatprep.subr.bf16.mxu1 %v1675_v60 }
 0x12e   : > { %1205 = vmatpush1.bf16.msra.mxu1 %v1673_v62 }
 0x12f   : > { %1206 = vmatprep.subr.bf16.mxu1 %v1681_v0 }
 0x132   : > { %1207 = vmatpush1.bf16.msra.mxu1 %v1679_v2 }
 0x1c8   : > { %v608_v10 = vpop.f32.mrb[0].mxu1 }
 0x1c9   : > { %v609_v11 = vadd.f32 %v608_v10, %v2132_v8  ;;  %v610_v12 = vpop.f32.mrb[1].mxu1 }
 0x1ca   : > { %v611_v13 = vadd.f32 %v610_v12, %v2136_v9  ;;  %v612_v14 = vpop.f32.mrb[2].mxu1 }
 0x1cb   : > { %v613_v15 = vadd.f32 %v612_v14, %v2132_v8  ;;  %v614_v16 = vpop.f32.mrb[3].mxu1  ;;  %v657_v18 = vmax.f32 %v609_v11, 0.0 }
 0x1cc   : > { %v615_v17 = vadd.f32 %v614_v16, %v2136_v9  ;;  %v658_v20 = vmax.f32 %v611_v13, 0.0 }
 0x1cd   : > { %v659_v19 = vmax.f32 %v613_v15, 0.0 }
 0x1ce   : > { %v660_v21 = vmax.f32 %v615_v17, 0.0 }
 0x1cf   : > { %v677_v22 = vpack.c.bf16 %v659_v19, %v657_v18 }
 0x1d0   : > { %v678_v23 = vpack.c.bf16 %v660_v21, %v658_v20  ;;  %v618_v24 = vpop.f32.mrb[4].mxu1  ;;  %v763_v21 = vsub.s32 2, %v2123_v4 }
 0x1d1   : > { %v619_v25 = vadd.f32 %v618_v24, %v2132_v8  ;;  %v620_v26 = vpop.f32.mrb[5].mxu1 }
 0x1d2   : > { %v621_v27 = vadd.f32 %v620_v26, %v2136_v9  ;;  %v622_v28 = vpop.f32.mrb[6].mxu1  ;;  %1125 = vmatprep.mubr.bf16.mxu0 %v678_v23  ;;  %1208 = vmatprep.mubr.bf16.mxu1 %v678_v23 }
 0x1d3   : > { %v623_v29 = vadd.f32 %v622_v28, %v2132_v8  ;;  %v624_v31 = vpop.f32.mrb[7].mxu1  ;;  %1126 = vmatmul.mubr.bf16.vlgmr.msra.gmra.mrb[12].mxu0 %v677_v22  ;;  %1209 = vmatmul.mubr.bf16.vlgmr.msra.gmra.mrb[20].mxu1 %v677_v22  ;;  %v661_v33 = vmax.f32 %v619_v25, 0.0  ;;  %v767_v22 = vsub.s32 3, %v2123_v4 }
 0x1d4   : > { %v625_v32 = vadd.f32 %v624_v31, %v2136_v9  ;;  %v662_v35 = vmax.f32 %v621_v27, 0.0 }
 0x1d5   : > { %v663_v34 = vmax.f32 %v623_v29, 0.0 }
 0x1d6   : > { %v664_v36 = vmax.f32 %v625_v32, 0.0 }
 0x1d7   : > { %v679_v37 = vpack.c.bf16 %v663_v34, %v661_v33 }
 0x1d8   : > { %v680_v38 = vpack.c.bf16 %v664_v36, %v662_v35  ;;  %v628_v39 = vpop.f32.mrb[8].mxu1 }
 0x1d9   : > { %v629_v40 = vadd.f32 %v628_v39, %v2132_v8  ;;  %v630_v41 = vpop.f32.mrb[9].mxu1 }
 0x1da   : > { %v631_v42 = vadd.f32 %v630_v41, %v2136_v9  ;;  %v632_v43 = vpop.f32.mrb[10].mxu1  ;;  %1135 = vmatprep.mubr.bf16.mxu0 %v680_v38  ;;  %1218 = vmatprep.mubr.bf16.mxu1 %v680_v38 }
 0x1db   : > { %v633_v44 = vadd.f32 %v632_v43, %v2132_v8  ;;  %v634_v45 = vpop.f32.mrb[11].mxu1  ;;  %1136 = vmatmul.mubr.bf16.gmra.mrb[16].mxu0 %v679_v37  ;;  %1219 = vmatmul.mubr.bf16.gmra.mrb[24].mxu1 %v679_v37  ;;  %v665_v47 = vmax.f32 %v629_v40, 0.0 }
 0x1dc   : > { %v635_v46 = vadd.f32 %v634_v45, %v2136_v9  ;;  %v666_v49 = vmax.f32 %v631_v42, 0.0 }
 0x1dd   : > { %v667_v48 = vmax.f32 %v633_v44, 0.0 }
 0x1de   : > { %v668_v30 = vmax.f32 %v635_v46, 0.0 }
 0x1df   : > { %v681_v50 = vpack.c.bf16 %v667_v48, %v665_v47 }
 0x1e0   : > { %v682_v51 = vpack.c.bf16 %v668_v30, %v666_v49  ;;  %v638_v52 = vpop.f32.mrb[12].mxu1 }
 0x1e1   : > { %v639_v53 = vadd.f32 %v638_v52, %v2132_v8  ;;  %v640_v54 = vpop.f32.mrb[13].mxu1 }
 0x1e2   : > { %v641_v55 = vadd.f32 %v640_v54, %v2136_v9  ;;  %v642_v56 = vpop.f32.mrb[14].mxu1  ;;  %1145 = vmatprep.mubr.bf16.mxu0 %v682_v51  ;;  %1228 = vmatprep.mubr.bf16.mxu1 %v682_v51 }
 0x1e3   : > { %v643_v57 = vadd.f32 %v642_v56, %v2132_v8  ;;  %v644_v58 = vpop.f32.mrb[15].mxu1  ;;  %1146 = vmatmul.mubr.bf16.gmra.mrb[20].mxu0 %v681_v50  ;;  %1229 = vmatmul.mubr.bf16.gmra.mrb[28].mxu1 %v681_v50  ;;  %v669_v60 = vmax.f32 %v639_v53, 0.0 }
 0x1e4   : > { %v645_v59 = vadd.f32 %v644_v58, %v2136_v9  ;;  %v670_v62 = vmax.f32 %v641_v55, 0.0 }
 0x1e5   : > { %v671_v61 = vmax.f32 %v643_v57, 0.0 }
 0x1e6   : > { %v672_v63 = vmax.f32 %v645_v59, 0.0 }
 0x1e7   : > { %v683_v0 = vpack.c.bf16 %v671_v61, %v669_v60 }
 0x1e8   : > { %v684_v1 = vpack.c.bf16 %v672_v63, %v670_v62  ;;  %v648_v2 = vpop.f32.mrb[16].mxu1 }
 0x1e9   : > { %v649_v3 = vadd.f32 %v648_v2, %v2132_v8  ;;  %v650_v6 = vpop.f32.mrb[17].mxu1 }
 0x1ea   : > { %v651_v10 = vadd.f32 %v650_v6, %v2136_v9  ;;  %v652_v11 = vpop.f32.mrb[18].mxu1  ;;  %1155 = vmatprep.mubr.bf16.mxu0 %v684_v1  ;;  %1238 = vmatprep.mubr.bf16.mxu1 %v684_v1 }
 0x1eb   : > { %v653_v12 = vadd.f32 %v652_v11, %v2132_v8  ;;  %v654_v13 = vpop.f32.mrb[19].mxu1  ;;  %1156 = vmatmul.mubr.bf16.gmra.mrb[24].mxu0 %v683_v0  ;;  %1239 = vmatmul.mubr.bf16.gmra.mrb[32].mxu1 %v683_v0  ;;  %v673_v15 = vmax.f32 %v649_v3, 0.0  ;;  %v751_v8 = vld [vmem:[%s2328_s6] sm:$0xf] }
 0x1ec   : > { %v655_v14 = vadd.f32 %v654_v13, %v2136_v9  ;;  %v674_v17 = vmax.f32 %v651_v10, 0.0  ;;  %v2168_v9 = vrot.slane %v751_v8, %v486_v5  ;;  %v2170_v23 = vrot.slane %v751_v8, %v763_v21 }
 0x1ed   : > { %v675_v16 = vmax.f32 %v653_v12, 0.0  ;;  %v2174_v24 = vrot.slane %v751_v8, %v490_v7  ;;  %v2176_v25 = vrot.slane %v751_v8, %v767_v22 }
 0x1ee   : > { %v676_v18 = vmax.f32 %v655_v14, 0.0 }
 0x1ef   : > { %v685_v19 = vpack.c.bf16 %v675_v16, %v673_v15 }
 0x1f0   : > { %v686_v20 = vpack.c.bf16 %v676_v18, %v674_v17 }
 0x1f2   : > { %1165 = vmatprep.mubr.bf16.mxu0 %v686_v20  ;;  %1248 = vmatprep.mubr.bf16.mxu1 %v686_v20 }
 0x1f3   : > { %1166 = vmatmul.mubr.bf16.gmra.mrb[28].mxu0 %v685_v19  ;;  %1249 = vmatmul.mubr.bf16.gmra.mrb[36].mxu1 %v685_v19 }
 0x2a6   : > { %v1127_v26 = vpop.f32.mrb[12].mxu0  ;;  %v1210_v27 = vpop.f32.mrb[20].mxu1 }
 0x2a7   : > { %v1128_v28 = vadd.f32 %v1127_v26, %v2168_v9  ;;  %v1211_v29 = vadd.f32 %v1210_v27, %v2170_v23  ;;  %v1129_v31 = vpop.f32.mrb[13].mxu0  ;;  %v1212_v32 = vpop.f32.mrb[21].mxu1 }
 0x2a8   : > { %v1130_v5 = vadd.f32 %v1129_v31, %v2174_v24  ;;  %v1213_v33 = vadd.f32 %v1212_v32, %v2176_v25  ;;  %v1131_v34 = vpop.f32.mrb[14].mxu0  ;;  %v1214_v35 = vpop.f32.mrb[22].mxu1 }
 0x2a9   : > { %1259 = vst [vmem:[%s2182_s8] sm:$0xff] %v1128_v28  ;;  %1261 = vst [vmem:[%s2182_s8 + $0x10] sm:$0xff] %v1211_v29  ;;  %v1132_v4 = vadd.f32 %v1131_v34, %v2168_v9  ;;  %v1215_v7 = vadd.f32 %v1214_v35, %v2170_v23  ;;  %v1133_v36 = vpop.f32.mrb[15].mxu0  ;;  %v1216_v37 = vpop.f32.mrb[23].mxu1 }
 0x2aa   : > { %1260 = vst [vmem:[%s2182_s8 + $0x8] sm:$0xff] %v1130_v5  ;;  %1263 = vst.msk [vmem:[%s2182_s8 + $0x18] sm:$0xff] %vm1262_vm2, %v1213_v33  ;;  %v1134_v38 = vadd.f32 %v1133_v36, %v2174_v24  ;;  %v1217_v39 = vadd.f32 %v1216_v37, %v2176_v25 }
 0x2ab   : > { %1264 = vst [vmem:[%s2182_s8 + $0x20] sm:$0xff] %v1132_v4  ;;  %1266 = vst [vmem:[%s2182_s8 + $0x30] sm:$0xff] %v1215_v7 }
 0x2ac   : > { %1265 = vst [vmem:[%s2182_s8 + $0x28] sm:$0xff] %v1134_v38  ;;  %1267 = vst.msk [vmem:[%s2182_s8 + $0x38] sm:$0xff] %vm1262_vm2, %v1217_v39 }
 0x2ae   : > { %v1137_v40 = vpop.f32.mrb[16].mxu0  ;;  %v1220_v41 = vpop.f32.mrb[24].mxu1 }
 0x2af   : > { %v1138_v42 = vadd.f32 %v1137_v40, %v2168_v9  ;;  %v1221_v43 = vadd.f32 %v1220_v41, %v2170_v23  ;;  %v1139_v44 = vpop.f32.mrb[17].mxu0  ;;  %v1222_v45 = vpop.f32.mrb[25].mxu1 }
 0x2b0   : > { %v1140_v46 = vadd.f32 %v1139_v44, %v2174_v24  ;;  %v1223_v47 = vadd.f32 %v1222_v45, %v2176_v25  ;;  %v1141_v48 = vpop.f32.mrb[18].mxu0  ;;  %v1224_v49 = vpop.f32.mrb[26].mxu1 }
 0x2b1   : > { %1268 = vst [vmem:[%s2182_s8 + $0x40] sm:$0xff] %v1138_v42  ;;  %1270 = vst [vmem:[%s2182_s8 + $0x50] sm:$0xff] %v1221_v43  ;;  %v1142_v30 = vadd.f32 %v1141_v48, %v2168_v9  ;;  %v1225_v50 = vadd.f32 %v1224_v49, %v2170_v23  ;;  %v1143_v51 = vpop.f32.mrb[19].mxu0  ;;  %v1226_v52 = vpop.f32.mrb[27].mxu1 }
 0x2b2   : > { %1269 = vst [vmem:[%s2182_s8 + $0x48] sm:$0xff] %v1140_v46  ;;  %1271 = vst.msk [vmem:[%s2182_s8 + $0x58] sm:$0xff] %vm1262_vm2, %v1223_v47  ;;  %v1144_v53 = vadd.f32 %v1143_v51, %v2174_v24  ;;  %v1227_v54 = vadd.f32 %v1226_v52, %v2176_v25 }
 0x2b3   : > { %1272 = vst [vmem:[%s2182_s8 + $0x60] sm:$0xff] %v1142_v30  ;;  %1274 = vst [vmem:[%s2182_s8 + $0x70] sm:$0xff] %v1225_v50 }
 0x2b4   : > { %1273 = vst [vmem:[%s2182_s8 + $0x68] sm:$0xff] %v1144_v53  ;;  %1275 = vst.msk [vmem:[%s2182_s8 + $0x78] sm:$0xff] %vm1262_vm2, %v1227_v54 }
 0x2b6   : > { %v1147_v55 = vpop.f32.mrb[20].mxu0  ;;  %v1230_v56 = vpop.f32.mrb[28].mxu1 }
 0x2b7   : > { %v1148_v57 = vadd.f32 %v1147_v55, %v2168_v9  ;;  %v1231_v58 = vadd.f32 %v1230_v56, %v2170_v23  ;;  %v1149_v59 = vpop.f32.mrb[21].mxu0  ;;  %v1232_v60 = vpop.f32.mrb[29].mxu1 }
 0x2b8   : > { %v1150_v61 = vadd.f32 %v1149_v59, %v2174_v24  ;;  %v1233_v62 = vadd.f32 %v1232_v60, %v2176_v25  ;;  %v1151_v63 = vpop.f32.mrb[22].mxu0  ;;  %v1234_v0 = vpop.f32.mrb[30].mxu1 }
 0x2b9   : > { %1276 = vst [vmem:[%s2182_s8 + $0x80] sm:$0xff] %v1148_v57  ;;  %1278 = vst [vmem:[%s2182_s8 + $0x90] sm:$0xff] %v1231_v58  ;;  %v1152_v1 = vadd.f32 %v1151_v63, %v2168_v9  ;;  %v1235_v2 = vadd.f32 %v1234_v0, %v2170_v23  ;;  %v1153_v3 = vpop.f32.mrb[23].mxu0  ;;  %v1236_v6 = vpop.f32.mrb[31].mxu1 }
 0x2ba   : > { %1277 = vst [vmem:[%s2182_s8 + $0x88] sm:$0xff] %v1150_v61  ;;  %1279 = vst.msk [vmem:[%s2182_s8 + $0x98] sm:$0xff] %vm1262_vm2, %v1233_v62  ;;  %v1154_v10 = vadd.f32 %v1153_v3, %v2174_v24  ;;  %v1237_v11 = vadd.f32 %v1236_v6, %v2176_v25 }
 0x2bb   : > { %1280 = vst [vmem:[%s2182_s8 + $0xa0] sm:$0xff] %v1152_v1  ;;  %1282 = vst [vmem:[%s2182_s8 + $0xb0] sm:$0xff] %v1235_v2 }
 0x2bc   : > { %1281 = vst [vmem:[%s2182_s8 + $0xa8] sm:$0xff] %v1154_v10  ;;  %1283 = vst.msk [vmem:[%s2182_s8 + $0xb8] sm:$0xff] %vm1262_vm2, %v1237_v11 }
 0x2be   : > { %v1157_v12 = vpop.f32.mrb[24].mxu0  ;;  %v1240_v13 = vpop.f32.mrb[32].mxu1 }
 0x2bf   : > { %v1158_v14 = vadd.f32 %v1157_v12, %v2168_v9  ;;  %v1241_v15 = vadd.f32 %v1240_v13, %v2170_v23  ;;  %v1159_v16 = vpop.f32.mrb[25].mxu0  ;;  %v1242_v17 = vpop.f32.mrb[33].mxu1 }
 0x2c0   : > { %v1160_v18 = vadd.f32 %v1159_v16, %v2174_v24  ;;  %v1243_v19 = vadd.f32 %v1242_v17, %v2176_v25  ;;  %v1161_v20 = vpop.f32.mrb[26].mxu0  ;;  %v1244_v21 = vpop.f32.mrb[34].mxu1 }
 0x2c1   : > { %1284 = vst [vmem:[%s2182_s8 + $0xc0] sm:$0xff] %v1158_v14  ;;  %1286 = vst [vmem:[%s2182_s8 + $0xd0] sm:$0xff] %v1241_v15  ;;  %v1162_v8 = vadd.f32 %v1161_v20, %v2168_v9  ;;  %v1245_v22 = vadd.f32 %v1244_v21, %v2170_v23  ;;  %v1163_v26 = vpop.f32.mrb[27].mxu0  ;;  %v1246_v27 = vpop.f32.mrb[35].mxu1 }
 0x2c2   : > { %1285 = vst [vmem:[%s2182_s8 + $0xc8] sm:$0xff] %v1160_v18  ;;  %1287 = vst.msk [vmem:[%s2182_s8 + $0xd8] sm:$0xff] %vm1262_vm2, %v1243_v19  ;;  %v1164_v28 = vadd.f32 %v1163_v26, %v2174_v24  ;;  %v1247_v29 = vadd.f32 %v1246_v27, %v2176_v25 }
 0x2c3   : > { %1288 = vst [vmem:[%s2182_s8 + $0xe0] sm:$0xff] %v1162_v8  ;;  %1290 = vst [vmem:[%s2182_s8 + $0xf0] sm:$0xff] %v1245_v22 }
 0x2c4   : > { %1289 = vst [vmem:[%s2182_s8 + $0xe8] sm:$0xff] %v1164_v28  ;;  %1291 = vst.msk [vmem:[%s2182_s8 + $0xf8] sm:$0xff] %vm1262_vm2, %v1247_v29 }
 0x2c6   : > { %v1167_v31 = vpop.f32.mrb[28].mxu0  ;;  %v1250_v32 = vpop.f32.mrb[36].mxu1 }
 0x2c7   : > { %v1168_v5 = vadd.f32 %v1167_v31, %v2168_v9  ;;  %v1251_v33 = vadd.f32 %v1250_v32, %v2170_v23  ;;  %v1169_v34 = vpop.f32.mrb[29].mxu0  ;;  %v1252_v35 = vpop.f32.mrb[37].mxu1 }
 0x2c8   : > { %v1170_v4 = vadd.f32 %v1169_v34, %v2174_v24  ;;  %v1253_v7 = vadd.f32 %v1252_v35, %v2176_v25  ;;  %v1171_v36 = vpop.f32.mrb[30].mxu0  ;;  %v1254_v37 = vpop.f32.mrb[38].mxu1 }
 0x2c9   : > { %1292 = vst [vmem:[%s2182_s8 + $0x100] sm:$0xff] %v1168_v5  ;;  %1294 = vst [vmem:[%s2182_s8 + $0x110] sm:$0xff] %v1251_v33  ;;  %v1172_v38 = vadd.f32 %v1171_v36, %v2168_v9  ;;  %v1255_v39 = vadd.f32 %v1254_v37, %v2170_v23  ;;  %v1173_v40 = vpop.f32.mrb[31].mxu0  ;;  %v1256_v41 = vpop.f32.mrb[39].mxu1 }
 0x2ca   : > { %1293 = vst [vmem:[%s2182_s8 + $0x108] sm:$0xff] %v1170_v4  ;;  %1295 = vst.msk [vmem:[%s2182_s8 + $0x118] sm:$0xff] %vm1262_vm2, %v1253_v7  ;;  %v1174_v9 = vadd.f32 %v1173_v40, %v2174_v24  ;;  %v1257_v23 = vadd.f32 %v1256_v41, %v2176_v25 }
 0x2cb   : > { %1296 = vst [vmem:[%s2182_s8 + $0x120] sm:$0xff] %v1172_v38  ;;  %1298 = vst [vmem:[%s2182_s8 + $0x130] sm:$0xff] %v1255_v39 }
 0x2cc   : > { %1297 = vst [vmem:[%s2182_s8 + $0x128] sm:$0xff] %v1174_v9  ;;  %1299 = vst.msk [vmem:[%s2182_s8 + $0x138] sm:$0xff] %vm1262_vm2, %v1257_v23 }
 0x2cd   : > { %1695 = shalt.err (!%p1692_p3)
}
 0x2ce   : > { %s1696_s22 = scalar_lea.hbm %s2265_s14, 5120  ;;  %s1700_s29 = scalar_lea.hbm %s2329_s7, 10240 }
 0x2cf   : > { %p1697_p4 = scmp.ne.s32.totalorder %s2265_s14, %s1696_s22  ;;  %p1701_p9 = scmp.lt.u32.totalorder %s2265_s14, %s2329_s7 }
 0x2d0   : > { %p1702_p10 = scmp.lt.u32.totalorder %s1700_s29, %s1696_s22  ;;  %p1704_p12 = scmp.lt.u32.totalorder %s1696_s22, %s2265_s14 }
 0x2d1   : > { %p1698_p7 = pnand %p1697_p4, %p1828_p5 }
 0x2d2   : > { %p1703_p11 = por %p1702_p10, %p1701_p9 }
 0x2d3   : > { %p1699_p8 = pneg %p1698_p7 }
 0x2d4   : > { %p1705_p13 = por %p1704_p12, %p1703_p11 }
 0x2d6   : > { %p1706_p0 = pnand %p1705_p13, %p1699_p8 }
 0x2d8   : > { %1709 = shalt.err (!%p1706_p0)
}
 0x2d9   : > { %s1748_s28 = smov 512   ;;  %s1749_s13 = smov 32  }
 0x2da   : > { %1520 = dma.vmem_to_hbm [thread:$0]  (%p1828_p5), %s2267_s9, 5120, %s2265_s14, %s2281_s15, %s1748_s28, %s1748_s28, %s1749_s13  }
 0x2db PF: > { %p1526_p1 = scmp.ge.s32.totalorder %s1744_s27, 2  ;;  %s1330_s16 = sand.u32 1, %s1732_s24  }
 0x2dc   : > { %s1331_s17 = scalar_lea.sflag [#allocation3], %s1330_s16 }
 0x2dd   : > { %p1523_p2 = pnand %p1526_p1, %p1832_p6 }
 0x2df   : > { %1727 = dma.done.wait (!%p1523_p2), %s1331_s17, 5120  }
 0x2e0   : > { %1729 = vsyncadd (!%p1523_p2), %s1331_s17, 4294962176  ;;  %p17_p3 = scmp.ge.s32.totalorder %s1815_s30, 4   ;;  %s2332_s24 = smov %s1736_s25 }
 0x2e1   : > { %s2333_s25 = smov %s1740_s26  ;;  %s2334_s26 = smov %s1826_s10 }
 0x2e2   : > { %s2335_s27 = smov %s1815_s30  ;;  %19 = sbr.rel (!%p17_p3) target bundleno = 3 (0x3), region = 83 }
 0x2e9   :  { %1336 = vsyncpa [#allocation3], 1 }
 0x2ea   :  { %1338 = vsyncpa [#allocation3 + $0x1], 1 }

</bundles_post_ra>
